<compile_context>
chip_gen: v6e
topology: v6e:2x2x1
jax: 0.10.0
libtpu: 0.0.40
codegen_flags: <defaults>
</compile_context>

<pallas_src>
import jax
import jax.numpy as jnp
from jax.experimental import pallas as pl
from jax.experimental.pallas import tpu as pltpu


def _round_up(x, m):
    return ((x + m - 1) // m) * m


def _cdiv(a, b):
    return (a + b - 1) // b


def _make_sos_partial_kernel(n_rows, tn, need_mask):
    """Per-block partial: sum over the block's valid rows of (dist_an - dist_pn)^2."""

    def kernel(a_ref, p_ref, n_ref, out_ref):
        a = a_ref[...].astype(jnp.float32)
        p = p_ref[...].astype(jnp.float32)
        nn = n_ref[...].astype(jnp.float32)

        da = a - nn
        dp = p - nn

        # Fused single cross-lane reduce:
        #   dist_an - dist_pn == sum(da^2 - dp^2, axis=1)
        # Keep it 2-D (tn, 1) to avoid a lane->sublane relayout.
        diff = jnp.sum(da * da - dp * dp, axis=1, keepdims=True)  # (tn, 1)

        if need_mask:
            # Ragged last row-tile: rows >= n_rows contain undefined data
            # (possibly NaN/Inf).  Mask with a select BEFORE squaring/summing;
            # never mask by multiplying (0 * NaN == NaN).
            row0 = pl.program_id(0) * tn
            rows = row0 + jax.lax.broadcasted_iota(jnp.int32, diff.shape, 0)
            diff = jnp.where(rows < n_rows, diff, 0.0)

        out_ref[0, 0] = jnp.sum(diff * diff)

    return kernel


def _vmem_limit_bytes():
    # 3/4 of physical VMEM -> 48 MiB on v7x (64 MiB), 96 MiB on v5e/v6e
    # (128 MiB), leaving headroom for Mosaic internal scratch / output staging.
    cap = 64 << 20  # conservative default (v7x)
    try:
        info = pltpu.get_tpu_info()
        cap = int(getattr(info, "vmem_capacity_bytes", cap) or cap)
    except Exception:
        pass
    return min((cap * 3) // 4, 96 << 20)


def sos_loss(anchors, positives, negatives):
    """anchors/positives/negatives: [N, D] (f32 or bf16). Returns scalar f32."""
    assert anchors.shape == positives.shape == negatives.shape
    N, D = anchors.shape
    if N == 0:
        # Reference divides by zero; mirror with NaN rather than crashing.
        return jnp.float32(jnp.nan)

    itemsize = jnp.dtype(anchors.dtype).itemsize
    sublane = max(8, 32 // itemsize)          # 8 rows (f32), 16 rows (bf16)
    bytes_per_row = D * itemsize

    vmem_limit = _vmem_limit_bytes()
    # 3 inputs x 2 pipeline buffers per grid step, plus slack.
    block_budget = vmem_limit // 7

    tn = max(sublane, (block_budget // bytes_per_row) // sublane * sublane)
    # Cap rows/block: far past ~8K rows the (tn, 1) per-row-sum intermediate
    # (1 active lane per vreg) starts costing VMEM for no bandwidth gain.
    tn = min(tn, 8192, _round_up(N, sublane))

    num_blocks = _cdiv(N, tn)

    # Prefer an even block count so the v7x megacore 'parallel' split engages
    # both TensorCores — only when the work is big enough that splitting is
    # not pure per-step overhead.
    if num_blocks == 1 and N * bytes_per_row >= (1 << 20):
        half = max(sublane, _round_up(_cdiv(N, 2), sublane))
        if _cdiv(N, half) == 2:
            tn, num_blocks = half, 2
    elif num_blocks > 1 and num_blocks % 2 == 1:
        tn_alt = max(sublane, _round_up(_cdiv(N, num_blocks + 1), sublane))
        if _cdiv(N, tn_alt) % 2 == 0:
            tn, num_blocks = tn_alt, _cdiv(N, tn_alt)

    need_mask = (N % tn) != 0
    kernel = _make_sos_partial_kernel(N, tn, need_mask)

    cost = pl.CostEstimate(
        flops=6 * N * D + 3 * N,
        transcendentals=0,
        bytes_accessed=3 * N * D * itemsize + num_blocks * 4,
    )

    partials = pl.pallas_call(
        kernel,
        out_shape=jax.ShapeDtypeStruct((num_blocks, 1), jnp.float32),
        grid=(num_blocks,),
        in_specs=[
            pl.BlockSpec((tn, D), lambda i: (i, 0)),
            pl.BlockSpec((tn, D), lambda i: (i, 0)),
            pl.BlockSpec((tn, D), lambda i: (i, 0)),
        ],
        out_specs=pl.BlockSpec((1, 1), lambda i: (i, 0),
                               memory_space=pltpu.SMEM),
        compiler_params=pltpu.CompilerParams(
            dimension_semantics=("parallel",),
            vmem_limit_bytes=vmem_limit,
        ),
        cost_estimate=cost,
    )(anchors, positives, negatives)

    # Final reduce + sqrt + divide by the TRUE N (not the block row count).
    return jnp.sqrt(jnp.sum(partials)) / jnp.float32(N)


def sos_loss_ref(anchors, positives, negatives):
    a = anchors.astype(jnp.float32)
    p = positives.astype(jnp.float32)
    n = negatives.astype(jnp.float32)
    dist_an = jnp.sum((a - n) ** 2, axis=1)
    dist_pn = jnp.sum((p - n) ** 2, axis=1)
    nq = anchors.shape[0]
    return jnp.sqrt(jnp.sum((dist_an - dist_pn) ** 2)) / nq


if __name__ == "__main__":
    key = jax.random.PRNGKey(0)

    # Case 1: aligned shapes (single 8-row block, no mask).
    k_a, k_p, k_n, key = jax.random.split(key, 4)
    N, D = 8, 128
    anchors = jax.random.normal(k_a, (N, D), dtype=jnp.float32)
    positives = jax.random.normal(k_p, (N, D), dtype=jnp.float32)
    negatives = jax.random.normal(k_n, (N, D), dtype=jnp.float32)

    loss = jax.block_until_ready(sos_loss(anchors, positives, negatives))
    ref = jax.block_until_ready(sos_loss_ref(anchors, positives, negatives))
    assert jnp.allclose(loss, ref, rtol=1e-5, atol=1e-5), (loss, ref)

    # Case 2: unaligned N and D (ragged row-tile -> in-kernel mask; full-D lane block).
    k_a, k_p, k_n, key = jax.random.split(key, 4)
    N2, D2 = 37, 96
    a2 = jax.random.normal(k_a, (N2, D2), dtype=jnp.float32)
    p2 = jax.random.normal(k_p, (N2, D2), dtype=jnp.float32)
    n2 = jax.random.normal(k_n, (N2, D2), dtype=jnp.float32)

    loss2 = jax.block_until_ready(sos_loss(a2, p2, n2))
    ref2 = jax.block_until_ready(sos_loss_ref(a2, p2, n2))
    assert jnp.allclose(loss2, ref2, rtol=1e-5, atol=1e-5), (loss2, ref2)

    # Case 3: bf16 inputs (16-row sublane tiles), unaligned shapes.
    k_a, k_p, k_n, key = jax.random.split(key, 4)
    N3, D3 = 50, 160
    a3 = jax.random.normal(k_a, (N3, D3), dtype=jnp.bfloat16)
    p3 = jax.random.normal(k_p, (N3, D3), dtype=jnp.bfloat16)
    n3 = jax.random.normal(k_n, (N3, D3), dtype=jnp.bfloat16)

    loss3 = jax.block_until_ready(sos_loss(a3, p3, n3))
    ref3 = jax.block_until_ready(sos_loss_ref(a3, p3, n3))
    assert jnp.allclose(loss3, ref3, rtol=1e-4, atol=1e-4), (loss3, ref3)

    print("KERNEL_OK")
</pallas_src>

<mosaic_0001>
module attributes {stable_mosaic.version = 11 : i64} {
  func.func @kernel(%arg0: i32, %arg1: memref<8x128xf32, #tpu.memory_space<vmem>>, %arg2: memref<8x128xf32, #tpu.memory_space<vmem>>, %arg3: memref<8x128xf32, #tpu.memory_space<vmem>>, %arg4: memref<1x1xf32, #tpu.memory_space<smem>>) attributes {dimension_semantics = [#tpu.dimension_semantics<parallel>], iteration_bounds = array<i64: 1>, scalar_prefetch = 0 : i64, scratch_operands = 0 : i64, tpu.core_type = #tpu.core_type<tc>, window_params = [{transform_indices = @transform_0, window_bounds = array<i64: 8, 128>}, {transform_indices = @transform_1, window_bounds = array<i64: 8, 128>}, {transform_indices = @transform_2, window_bounds = array<i64: 8, 128>}, {transform_indices = @transform_3, window_bounds = array<i64: 1, 1>}]} {
    %c0 = arith.constant 0 : index
    %c0_0 = arith.constant 0 : index
    %0 = vector.load %arg1[%c0, %c0_0] : memref<8x128xf32, #tpu.memory_space<vmem>>, vector<8x128xf32>
    %c0_1 = arith.constant 0 : index
    %c0_2 = arith.constant 0 : index
    %1 = vector.load %arg2[%c0_1, %c0_2] : memref<8x128xf32, #tpu.memory_space<vmem>>, vector<8x128xf32>
    %c0_3 = arith.constant 0 : index
    %c0_4 = arith.constant 0 : index
    %2 = vector.load %arg3[%c0_3, %c0_4] : memref<8x128xf32, #tpu.memory_space<vmem>>, vector<8x128xf32>
    %3 = arith.subf %0, %2 : vector<8x128xf32>
    %4 = arith.subf %1, %2 : vector<8x128xf32>
    %5 = arith.mulf %3, %3 : vector<8x128xf32>
    %6 = arith.mulf %4, %4 : vector<8x128xf32>
    %7 = arith.subf %5, %6 : vector<8x128xf32>
    %cst = arith.constant dense<0.000000e+00> : vector<8xf32>
    %8 = vector.multi_reduction <add>, %7, %cst [1] : vector<8x128xf32> to vector<8xf32>
    %9 = vector.shape_cast %8 : vector<8xf32> to vector<8x1xf32>
    %10 = arith.mulf %9, %9 : vector<8x1xf32>
    %11 = vector.shape_cast %10 : vector<8x1xf32> to vector<1x8x1xf32>
    %cst_5 = arith.constant dense<0.000000e+00> : vector<1xf32>
    %12 = vector.multi_reduction <add>, %11, %cst_5 [1, 2] : vector<1x8x1xf32> to vector<1xf32>
    %13 = vector.shape_cast %12 : vector<1xf32> to vector<1x1x1xf32>
    %14 = vector.extract %13[0, 0, 0] : f32 from vector<1x1x1xf32>
    %c0_6 = arith.constant 0 : index
    %c0_7 = arith.constant 0 : index
    %15 = memref.load %arg4[%c0_6, %c0_7] : memref<1x1xf32, #tpu.memory_space<smem>>
    memref.store %14, %arg4[%c0_6, %c0_7] : memref<1x1xf32, #tpu.memory_space<smem>>
    return
  }
  func.func @transform_0(%arg0: i32) -> (i32, i32) {
    %c0_i32 = arith.constant 0 : i32
    %c0_i32_0 = arith.constant 0 : i32
    return %arg0, %c0_i32 : i32, i32
  }
  func.func @transform_1(%arg0: i32) -> (i32, i32) {
    %c0_i32 = arith.constant 0 : i32
    %c0_i32_0 = arith.constant 0 : i32
    return %arg0, %c0_i32 : i32, i32
  }
  func.func @transform_2(%arg0: i32) -> (i32, i32) {
    %c0_i32 = arith.constant 0 : i32
    %c0_i32_0 = arith.constant 0 : i32
    return %arg0, %c0_i32 : i32, i32
  }
  func.func @transform_3(%arg0: i32) -> (i32, i32) {
    %c0_i32 = arith.constant 0 : i32
    %c0_i32_0 = arith.constant 0 : i32
    return %arg0, %c0_i32 : i32, i32
  }
}

</mosaic_0001>

<bundles_post_ra>
// kernel: tpu_custom_call.1
= control target key start
LH: loop header
LB: loop body
LE: loop exit
PB: predicated region body
PF: predicated region fallthrough
CT: control target
= control target key end

     0   :  { %8 = vsyncpa [#allocation3], 0  ;;  %s205_s0 = inlined_call_operand.hbm [shape: f32[8,128], index: 0, kind: input, shape index: {}]   ;;  %s206_s1 = inlined_call_operand.hbm [shape: f32[8,128], index: 1, kind: input, shape index: {}]   ;;  %s207_s2 = inlined_call_operand.hbm [shape: f32[8,128], index: 2, kind: input, shape index: {}]   ;;  %s208_s3 = inlined_call_operand.hbm [shape: f32[1,1], index: 3, kind: output, shape index: {}]  }
   0x1   :  { %9 = vsyncpa [#allocation6], 0 }
   0x2   :  { %10 = vsyncpa [#allocation4], 0  ;;  %s169_s12 = smov [#allocation5]   ;;  %s170_s14 = smov [#allocation2]  }
   0x3   :  { %s27_s13 = sshll.u32 %s169_s12, 4  ;;  %s17_s15 = sshll.u32 %s170_s14, 4  ;;  %s28_s13 = int_to_ptr.vmem [resolvable:$true] %s27_s13  ;;  %s18_s15 = int_to_ptr.vmem [resolvable:$true] %s17_s15 }
   0x4   :  { %s103_s16 = scalar_lea.vmem %s28_s13, 128  ;;  %p108_p1 = scmp.lt.s32.totalorder %s28_s13, %s28_s13 }
   0x5   :  { %p104_p0 = scmp.ne.s32.totalorder %s28_s13, %s103_s16  ;;  %p109_p2 = scmp.lt.s32.totalorder %s103_s16, %s103_s16 }
   0x7   :  { %p110_p3 = por %p109_p2, %p108_p1 }
   0x9   :  { %p111_p4 = pnand %p110_p3, %p104_p0 }
   0xb   :  { %114 = shalt.err (!%p111_p4)
}
   0xc   :  { %30 = dma.hbm_to_vmem [thread:$0]  %s206_s1, 128, %s28_s13, [#allocation6]  }
   0xd   :  { %s123_s19 = scalar_lea.vmem %s18_s15, 128  ;;  %p128_p6 = scmp.lt.s32.totalorder %s18_s15, %s18_s15 }
   0xe   :  { %p124_p5 = scmp.ne.s32.totalorder %s18_s15, %s123_s19  ;;  %p129_p7 = scmp.lt.s32.totalorder %s123_s19, %s123_s19 }
  0x10   :  { %p130_p8 = por %p129_p7, %p128_p6 }
  0x12   :  { %p131_p9 = pnand %p130_p8, %p124_p5 }
  0x14   :  { %134 = shalt.err (!%p131_p9)
}
  0x15   :  { %20 = dma.hbm_to_vmem [thread:$0]  %s205_s0, 128, %s18_s15, [#allocation3]  }
  0x16   :  { %s171_s22 = smov [#allocation7]  }
  0x17   :  { %s37_s23 = sshll.u32 %s171_s22, 4  ;;  %s38_s23 = int_to_ptr.vmem [resolvable:$true] %s37_s23 }
  0x18   :  { %s143_s24 = scalar_lea.vmem %s38_s23, 128  ;;  %p148_p11 = scmp.lt.s32.totalorder %s38_s23, %s38_s23 }
  0x19   :  { %p144_p10 = scmp.ne.s32.totalorder %s38_s23, %s143_s24  ;;  %p149_p12 = scmp.lt.s32.totalorder %s143_s24, %s143_s24 }
  0x1b   :  { %p150_p13 = por %p149_p12, %p148_p11 }
  0x1d   :  { %p151_p0 = pnand %p150_p13, %p144_p10 }
  0x1f   :  { %154 = shalt.err (!%p151_p0)
}
  0x20   :  { %40 = dma.hbm_to_vmem [thread:$0]  %s207_s2, 128, %s38_s23, [#allocation6]  }
  0x21   :  { %163 = dma.done.wait [#allocation3], 128  }
  0x22   :  { %164 = vsyncadd [#allocation3], 4294967168 }
  0x23   :  { %165 = dma.done.wait [#allocation6], 256  }
  0x24   :  { %166 = vsyncadd [#allocation6], 4294967040  ;;  %v50_v0 = vld [vmem:[#allocation2] sm:$0xff]  ;;  %v51_v1 = vld [vmem:[#allocation5] sm:$0xff]  ;;  %vm61_vm0 = vcmask 7168   ;;  %s172_s2 = smov [#allocation8]  }
  0x25   :  { %v52_v2 = vld [vmem:[#allocation7] sm:$0xff] }
  0x26   :  { %v53_v3 = vsub.f32 %v50_v0, %v52_v2  ;;  %v54_v4 = vsub.f32 %v51_v1, %v52_v2 }
  0x28   :  { %v55_v5 = vmul.f32 %v53_v3, %v53_v3  ;;  %v56_v6 = vmul.f32 %v54_v4, %v54_v4 }
  0x2a   :  { %v57_v7 = vsub.f32 %v55_v5, %v56_v6 }
  0x2c   :  { %58 = vadd.xlane.f32.xlu0 %v57_v7 }
  0xb5   :  { %v59_v8 = vpop.xlane.xlu0 %58 }
  0xb6   :  { %v60_v9 = vmul.f32 %v59_v8, %v59_v8 }
  0xb8   :  { %v62_v10 = vsel %vm61_vm0, %v60_v9, 0.0 }
  0xb9   :  { %63 = vadd.xlane.f32.xlu0 %v62_v10 }
 0x142   :  { %v64_v11 = vpop.xlane.xlu0 %63 }
 0x143   :  { %v65_v12 = vrot.slane %v64_v11, 4 }
 0x145   :  { %v66_v13 = vadd.f32 %v65_v12, %v64_v11 }
 0x147   :  { %v67_v14 = vrot.slane %v66_v13, 2 }
 0x149   :  { %v68_v15 = vadd.f32 %v67_v14, %v66_v13 }
 0x14b   :  { %v69_v16 = vrot.slane %v68_v15, 1 }
 0x14d   :  { %v70_v17 = vadd.f32 %v69_v16, %v68_v15 }
 0x14f   :  { %89 = vpush %v70_v17 }
 0x180   :  { %s90_s0 = spop %89 }
 0x181   :  { %73 = sst [smem:[#allocation8]] %s90_s0 }
 0x182   :  { %81 = dma.smem_to_hbm %s172_s2, 16, %s208_s3, [#allocation4]  }
 0x183   :  { %167 = dma.done.wait [#allocation4], 16  }
 0x184   :  { %168 = vsyncadd [#allocation4], 4294967280 }
 0x185   :  { %85 = sfence }
 0x186   :  { %86 = vsyncpa [#allocation3], 1 }
 0x187   :  { %87 = vsyncpa [#allocation6], 1 }
 0x188   :  { %88 = vsyncpa [#allocation4], 1 }

</bundles_post_ra>
